<compile_context>
chip_gen: v7x
topology: tpu7x:2x2x1
jax: 0.10.0
libtpu: 0.0.40
codegen_flags: <defaults>
</compile_context>

<pallas_src>
import functools

import jax
import jax.numpy as jnp
from jax.experimental import pallas as pl
from jax.experimental.pallas import tpu as pltpu

EPS = 1e-5


def double_conv_kernel(xk1_ref, b1_ref, g1_ref, be1_ref,
                       b2_ref, g2_ref, be2_ref, pinv_ref,
                       out_ref, h1pad_ref, stats_ref, *, N, H, W, cout):
    """Single-program kernel, everything VMEM-resident (toy sizes).

    xk1_ref  : (N*H, 3*K1)        stage-1 LHS: 3 dy taps K-concatenated, each tap a
                                  lane-padded (K1 = ceil((W+2)*Cin/128)*128) padded row
    b1_ref   : (3*K1, W*cout)     stage-1 banded weights (dx taps folded into the band)
    b2_ref   : (3*W*cout, W*cout) stage-2 banded weights over the UNPADDED h1 layout
                                  (SAME left/right boundary folded in)
    g*_ref, be*_ref : (1, W*cout) BN gamma/beta pre-tiled to the lane layout
    pinv_ref : (W*cout, W*cout)   channel fold/broadcast projection, pre-scaled 1/(NHW)
    out_ref  : (N*H, W*cout)      lane-dense output (here 32 x 128)
    h1pad_ref: (N, H+2, W*cout)   scratch: stage-1 output with a 1-row zero dy halo
    stats_ref: (2, W*cout)        scratch: stacked colsum / colsq for the BN fold
    """
    Hp = H + 2
    NH = N * H
    WC = W * cout
    f32 = jnp.float32

    def bn_relu(acc, g_d, be_d):
        # Train-mode BN (biased var) + ReLU folded into one scale/shift FMA + max.
        # Stats: ONE (2,WC)x(WC,WC) matmul; pinv is pre-scaled by 1/(N*H*W) so the
        # fold directly yields (E[x], E[x^2]) broadcast back to the lane layout.
        stats_ref[0:1, :] = jnp.sum(acc, axis=0, keepdims=True)
        stats_ref[1:2, :] = jnp.sum(acc * acc, axis=0, keepdims=True)
        stats_ref[...] = jnp.dot(stats_ref[...], pinv_ref[...],
                                 preferred_element_type=f32)
        mean_d = stats_ref[0:1, :]
        var_d = stats_ref[1:2, :] - mean_d * mean_d          # single-pass variance
        # TODO(synk): E[x^2]-E[x]^2 can cancel at production sizes (post-ReLU inputs
        # have large means); switch to two-pass / per-block centered sums when
        # re-tiling for real UNet shapes.
        s_d = g_d * jax.lax.rsqrt(var_d + EPS)               # EUP rsqrt
        t_d = be_d - mean_d * s_d
        return jnp.maximum(acc * s_d + t_d, 0.0)

    # ---------------- stage 1: conv1 + BN1 + ReLU ----------------
    # One matmul for the whole 3x3 conv (dy taps K-concatenated in the wrapper).
    # Conv bias omitted: it cancels exactly under train-mode BatchNorm.
    acc1 = jnp.dot(xk1_ref[...], b1_ref[...], preferred_element_type=f32)
    h1 = bn_relu(acc1, g1_ref[...], be1_ref[...])            # (NH, WC) f32

    # Stage-1 output -> (N, Hp, WC) scratch: full-lane, lane-aligned stores only.
    # The SAME left/right boundary lives in b2, so no column padding is needed;
    # only the two dy-halo rows are zeroed.
    zrow = jnp.zeros((N, 1, WC), f32)
    h1pad_ref[:, 0:1, :] = zrow
    h1pad_ref[:, Hp - 1:Hp, :] = zrow
    h1pad_ref[:, 1:1 + H, :] = h1.reshape(N, H, WC)

    # ---------------- stage 2: conv2 + BN2 + ReLU ----------------
    # Build the K-concatenated LHS once (3 lane-aligned row-window reads + one lane
    # concat) and issue a single (NH, 3*WC) x (3*WC, WC) matmul.
    lhs2 = jnp.concatenate(
        [h1pad_ref[:, dy:dy + H, :] for dy in range(3)], axis=-1).reshape(NH, 3 * WC)
    acc2 = jnp.dot(lhs2.astype(b2_ref.dtype), b2_ref[...],
                   preferred_element_type=f32)
    out_ref[...] = bn_relu(acc2, g2_ref[...], be2_ref[...])


def _band1(w_hwio, cin, cout, W, Kp):
    """(3,3,cin,cout) -> (3*Kp, W*cout) banded weights over the PADDED row layout.

    band[dy*Kp + xp*cin + c, x*cout + o] = w[dy, xp-x, c, o] for xp-x in {0,1,2};
    rows [Wp*cin, Kp) of each dy slab are zero (lane padding of the stage-1 LHS).
    """
    Wp = W + 2
    xp = jnp.arange(Wp)[:, None, None]
    dx = jnp.arange(3)[None, :, None]
    xo = jnp.arange(W)[None, None, :]
    sel = (xp == xo + dx).astype(jnp.float32)                  # (Wp, 3, W)
    band = jnp.einsum('pdx,ydco->ypcxo', sel, w_hwio)          # (3, Wp, cin, W, cout)
    band = band.reshape(3, Wp * cin, W * cout)
    band = jnp.pad(band, ((0, 0), (0, Kp - Wp * cin), (0, 0)))
    return band.reshape(3 * Kp, W * cout)


def _band2(w_hwio, cout, W):
    """(3,3,cout,cout) -> (3*W*cout, W*cout) banded weights over the UNPADDED layout.

    band[dy*W*cout + xin*cout + c, x*cout + o] = w[dy, xin-x+1, c, o] for
    xin-x+1 in {0,1,2}; out-of-range dx taps (SAME boundary) simply have no row.
    """
    xin = jnp.arange(W)[:, None, None]
    dx = jnp.arange(3)[None, :, None]
    xo = jnp.arange(W)[None, None, :]
    sel = (xin == xo + dx - 1).astype(jnp.float32)             # (W, 3, W)
    band = jnp.einsum('pdx,ydco->ypcxo', sel, w_hwio)          # (3, W, cout, W, cout)
    return band.reshape(3 * W * cout, W * cout)


def double_conv(x_nchw, params, *, matmul_dtype=jnp.float32):
    """Wrapper: accepts NCHW (PyTorch convention), returns NCHW.

    matmul_dtype=jnp.bfloat16 runs the MXU with bf16 operands (f32 accumulation) —
    the recommended setting on v6e/v7x for production channel counts; the default
    f32 path matches PyTorch f32 forward semantics.
    """
    x = jnp.transpose(x_nchw, (0, 2, 3, 1)).astype(jnp.float32)    # NHWC
    N, H, W, Cin = x.shape
    Cout = params["w2"].shape[-1]
    Hp, Wp = H + 2, W + 2
    WC = W * Cout
    K1 = ((Wp * Cin + 127) // 128) * 128       # per-tap stage-1 K, lane-padded to 128

    # Stage-1 LHS (pure layout plumbing, done once): spatially padded rows, lane-padded
    # to K1, then the 3 dy taps K-concatenated so the kernel does a single matmul.
    xpad = jnp.pad(x, ((0, 0), (1, 1), (1, 1), (0, 0))).reshape(N, Hp, Wp * Cin)
    xpad = jnp.pad(xpad, ((0, 0), (0, 0), (0, K1 - Wp * Cin)))
    xk1 = jnp.concatenate([xpad[:, dy:dy + H, :] for dy in range(3)],
                          axis=-1).reshape(N * H, 3 * K1).astype(matmul_dtype)

    # Banded weights, cast once to the MXU operand dtype.
    b1 = _band1(params["w1"].reshape(3, 3, Cin, Cout), Cin, Cout, W, K1).astype(matmul_dtype)
    b2 = _band2(params["w2"].reshape(3, 3, Cout, Cout), Cout, W).astype(matmul_dtype)
    # NOTE: conv biases b1/b2 are NOT passed to the kernel — any per-channel constant
    # cancels exactly under train-mode BatchNorm.

    g1 = jnp.tile(params["g1"].reshape(1, Cout), (1, W))
    be1 = jnp.tile(params["be1"].reshape(1, Cout), (1, W))
    g2 = jnp.tile(params["g2"].reshape(1, Cout), (1, W))
    be2 = jnp.tile(params["be2"].reshape(1, Cout), (1, W))

    # Channel fold/broadcast projection pre-scaled by 1/(N*H*W):
    # pinv[x*Cout+c, x'*Cout+c'] = (c == c') / (N*H*W).
    lane = jnp.arange(WC)
    pinv = (lane[:, None] % Cout == lane[None, :] % Cout).astype(jnp.float32)
    pinv = pinv * (1.0 / float(N * H * W))

    # Scoped-VMEM budget: ~3x raw resident bytes ((8,128) padding + double-buffer
    # headroom), capped at 3/4 of the physical per-core VMEM (v7x: 64 MiB per TC).
    itemsize = jnp.dtype(matmul_dtype).itemsize
    raw = (itemsize * (xk1.size + b1.size + b2.size)
           + 4 * (pinv.size + 4 * WC + 2 * WC + N * H * WC + N * Hp * WC))
    try:
        vmem_cap = int(pltpu.get_tpu_info().vmem_capacity_bytes)
    except Exception:
        vmem_cap = 64 << 20                     # conservative: v7x per-TC capacity
    vmem_limit = int(min(max(3 * raw, 8 << 20), (3 * vmem_cap) // 4))

    vmem = pl.BlockSpec(memory_space=pltpu.MemorySpace.VMEM)
    out = pl.pallas_call(
        functools.partial(double_conv_kernel, N=N, H=H, W=W, cout=Cout),
        out_shape=jax.ShapeDtypeStruct((N * H, WC), jnp.float32),
        in_specs=[vmem] * 8,
        out_specs=vmem,
        scratch_shapes=[pltpu.VMEM((N, Hp, WC), jnp.float32),
                        pltpu.VMEM((2, WC), jnp.float32)],
        compiler_params=pltpu.CompilerParams(vmem_limit_bytes=vmem_limit),
    )(xk1, b1, g1, be1, b2, g2, be2, pinv)

    # TODO(synk): at production UNet sizes (C=64..512, H=W>=64) re-tile this
    # single-program kernel: (a) row-block grid with a 1-row halo and
    # dimension_semantics=("parallel",) so v7x's two TensorCores split the work and
    # Pallas pipelines HBM<->VMEM behind compute; (b) two-phase BatchNorm stats
    # (per-block colsum/colsq partials + a finalize pass) — batch-global BN stats are
    # why a single parallel grid cannot be used here; (c) W-tile the banded RHS
    # (it grows O(W^2*Cin*Cout)) or fall back to 9 shifted K=Cin matmuls once Cin>=128.
    return jnp.transpose(out.reshape(N, H, W, Cout), (0, 3, 1, 2))   # back to NCHW


def reference(x_nchw, params):
    """Pure-JAX reference (exact PyTorch train-mode forward semantics, incl. bias)."""
    x = jnp.transpose(x_nchw, (0, 2, 3, 1)).astype(jnp.float32)
    Cin = x.shape[-1]
    Cout = params["w2"].shape[-1]

    def conv(h, w_flat, b, cin, cout):
        w = w_flat.reshape(3, 3, cin, cout)                        # HWIO
        y = jax.lax.conv_general_dilated(
            h, w, window_strides=(1, 1), padding="SAME",
            dimension_numbers=("NHWC", "HWIO", "NHWC"))
        return y + b.reshape(1, 1, 1, cout)

    def bn_relu(h, g, be):
        m = jnp.mean(h, axis=(0, 1, 2), keepdims=True)
        v = jnp.mean((h - m) ** 2, axis=(0, 1, 2), keepdims=True)  # biased var
        y = g.reshape(1, 1, 1, -1) * (h - m) * jax.lax.rsqrt(v + EPS) \
            + be.reshape(1, 1, 1, -1)
        return jnp.maximum(y, 0.0)

    h = bn_relu(conv(x, params["w1"], params["b1"], Cin, Cout),
                params["g1"], params["be1"])
    h = bn_relu(conv(h, params["w2"], params["b2"], Cout, Cout),
                params["g2"], params["be2"])
    return jnp.transpose(h, (0, 3, 1, 2))


def init_params(key, cin, cout):
    ks = jax.random.split(key, 8)
    scale1 = 1.0 / jnp.sqrt(cin * 9.0)
    scale2 = 1.0 / jnp.sqrt(cout * 9.0)
    return {
        "w1": jax.random.normal(ks[0], (9, cin, cout), jnp.float32) * scale1,
        "b1": jax.random.normal(ks[1], (1, cout), jnp.float32) * scale1,
        "g1": 1.0 + 0.1 * jax.random.normal(ks[2], (1, cout), jnp.float32),
        "be1": 0.1 * jax.random.normal(ks[3], (1, cout), jnp.float32),
        "w2": jax.random.normal(ks[4], (9, cout, cout), jnp.float32) * scale2,
        "b2": jax.random.normal(ks[5], (1, cout), jnp.float32) * scale2,
        "g2": 1.0 + 0.1 * jax.random.normal(ks[6], (1, cout), jnp.float32),
        "be2": 0.1 * jax.random.normal(ks[7], (1, cout), jnp.float32),
    }
    # TODO(synk): BatchNorm running_mean/running_var buffer updates (in-place
    # training side effect) are not reproduced; they do not affect the forward output.


if __name__ == "__main__":
    key = jax.random.PRNGKey(0)
    k_x, k_p = jax.random.split(key)

    N, Cin, Cout, H, W = 2, 4, 8, 16, 16
    x = jax.random.normal(k_x, (N, Cin, H, W), jnp.float32)        # NCHW like PyTorch
    params = init_params(k_p, Cin, Cout)

    ref = jax.block_until_ready(reference(x, params))

    # Exact f32 path (matches PyTorch f32 forward semantics).
    out = jax.block_until_ready(double_conv(x, params))
    assert out.shape == (N, Cout, H, W), out.shape
    assert jnp.allclose(out, ref, atol=1e-4, rtol=1e-4), \
        float(jnp.max(jnp.abs(out - ref)))

    # bf16 MXU-operand path (v6e/v7x perf recommendation); accumulation stays f32,
    # so only operand-rounding error is expected.
    out_bf16 = jax.block_until_ready(double_conv(x, params, matmul_dtype=jnp.bfloat16))
    assert jnp.allclose(out_bf16, ref, atol=5e-2, rtol=5e-2), \
        float(jnp.max(jnp.abs(out_bf16 - ref)))

    print("KERNEL_OK")
</pallas_src>

<mosaic_0001>
module attributes {stable_mosaic.version = 11 : i64} {
  func.func @double_conv_kernel(%arg0: memref<32x384xf32, #tpu.memory_space<vmem>>, %arg1: memref<384x128xf32, #tpu.memory_space<vmem>>, %arg2: memref<1x128xf32, #tpu.memory_space<vmem>>, %arg3: memref<1x128xf32, #tpu.memory_space<vmem>>, %arg4: memref<384x128xf32, #tpu.memory_space<vmem>>, %arg5: memref<1x128xf32, #tpu.memory_space<vmem>>, %arg6: memref<1x128xf32, #tpu.memory_space<vmem>>, %arg7: memref<128x128xf32, #tpu.memory_space<vmem>>, %arg8: memref<32x128xf32, #tpu.memory_space<vmem>>, %arg9: memref<2x18x128xf32, #tpu.memory_space<vmem>>, %arg10: memref<2x128xf32, #tpu.memory_space<vmem>>) attributes {dimension_semantics = [], scalar_prefetch = 0 : i64, scratch_operands = 2 : i64, tpu.core_type = #tpu.core_type<tc>} {
    %c0 = arith.constant 0 : index
    %c0_0 = arith.constant 0 : index
    %0 = vector.load %arg0[%c0, %c0_0] : memref<32x384xf32, #tpu.memory_space<vmem>>, vector<32x384xf32>
    %c0_1 = arith.constant 0 : index
    %c0_2 = arith.constant 0 : index
    %1 = vector.load %arg1[%c0_1, %c0_2] : memref<384x128xf32, #tpu.memory_space<vmem>>, vector<384x128xf32>
    %cst = arith.constant dense<0.000000e+00> : vector<32x128xf32>
    %2 = tpu.matmul %0, %1, %cst {dimension_numbers = #tpu.dot_dimension_numbers<[1], [0], [0], [1], [0, 0, 1, 1], [], []>} : vector<32x384xf32>, vector<384x128xf32>, vector<32x128xf32> -> vector<32x128xf32>
    %c0_3 = arith.constant 0 : index
    %c0_4 = arith.constant 0 : index
    %3 = vector.load %arg2[%c0_3, %c0_4] : memref<1x128xf32, #tpu.memory_space<vmem>>, vector<1x128xf32>
    %c0_5 = arith.constant 0 : index
    %c0_6 = arith.constant 0 : index
    %4 = vector.load %arg3[%c0_5, %c0_6] : memref<1x128xf32, #tpu.memory_space<vmem>>, vector<1x128xf32>
    %cst_7 = arith.constant dense<0.000000e+00> : vector<128xf32>
    %5 = vector.multi_reduction <add>, %2, %cst_7 [0] : vector<32x128xf32> to vector<128xf32>
    %6 = vector.shape_cast %5 : vector<128xf32> to vector<1x128xf32>
    %c0_8 = arith.constant 0 : index
    %c0_9 = arith.constant 0 : index
    %7 = vector.load %arg10[%c0_8, %c0_9] : memref<2x128xf32, #tpu.memory_space<vmem>>, vector<1x128xf32>
    tpu.vector_store %arg10[%c0_8, %c0_9], %6 {strides = array<i32>} : memref<2x128xf32, #tpu.memory_space<vmem>>, vector<1x128xf32>,
    %8 = arith.mulf %2, %2 : vector<32x128xf32>
    %cst_10 = arith.constant dense<0.000000e+00> : vector<128xf32>
    %9 = vector.multi_reduction <add>, %8, %cst_10 [0] : vector<32x128xf32> to vector<128xf32>
    %10 = vector.shape_cast %9 : vector<128xf32> to vector<1x128xf32>
    %c1 = arith.constant 1 : index
    %c0_11 = arith.constant 0 : index
    %11 = vector.load %arg10[%c1, %c0_11] : memref<2x128xf32, #tpu.memory_space<vmem>>, vector<1x128xf32>
    tpu.vector_store %arg10[%c1, %c0_11], %10 {strides = array<i32>} : memref<2x128xf32, #tpu.memory_space<vmem>>, vector<1x128xf32>,
    %c0_12 = arith.constant 0 : index
    %c0_13 = arith.constant 0 : index
    %12 = vector.load %arg10[%c0_12, %c0_13] : memref<2x128xf32, #tpu.memory_space<vmem>>, vector<2x128xf32>
    %c0_14 = arith.constant 0 : index
    %c0_15 = arith.constant 0 : index
    %13 = vector.load %arg7[%c0_14, %c0_15] : memref<128x128xf32, #tpu.memory_space<vmem>>, vector<128x128xf32>
    %cst_16 = arith.constant dense<0.000000e+00> : vector<2x128xf32>
    %14 = tpu.matmul %12, %13, %cst_16 {dimension_numbers = #tpu.dot_dimension_numbers<[1], [0], [0], [1], [0, 0, 1, 1], [], []>} : vector<2x128xf32>, vector<128x128xf32>, vector<2x128xf32> -> vector<2x128xf32>
    %c0_17 = arith.constant 0 : index
    %c0_18 = arith.constant 0 : index
    %15 = vector.load %arg10[%c0_17, %c0_18] : memref<2x128xf32, #tpu.memory_space<vmem>>, vector<2x128xf32>
    tpu.vector_store %arg10[%c0_17, %c0_18], %14 {strides = array<i32>} : memref<2x128xf32, #tpu.memory_space<vmem>>, vector<2x128xf32>,
    %c0_19 = arith.constant 0 : index
    %c0_20 = arith.constant 0 : index
    %16 = vector.load %arg10[%c0_19, %c0_20] : memref<2x128xf32, #tpu.memory_space<vmem>>, vector<1x128xf32>
    %c1_21 = arith.constant 1 : index
    %c0_22 = arith.constant 0 : index
    %17 = vector.load %arg10[%c1_21, %c0_22] : memref<2x128xf32, #tpu.memory_space<vmem>>, vector<1x128xf32>
    %18 = arith.mulf %16, %16 : vector<1x128xf32>
    %19 = arith.subf %17, %18 : vector<1x128xf32>
    %cst_23 = arith.constant 9.99999974E-6 : f32
    %20 = vector.broadcast %cst_23 : f32 to vector<1x128xf32>
    %21 = arith.addf %19, %20 : vector<1x128xf32>
    %22 = math.rsqrt %21 : vector<1x128xf32>
    %23 = arith.mulf %3, %22 : vector<1x128xf32>
    %24 = arith.mulf %16, %23 : vector<1x128xf32>
    %25 = arith.subf %4, %24 : vector<1x128xf32>
    %26 = vector.broadcast %23 : vector<1x128xf32> to vector<32x128xf32>
    %27 = arith.mulf %2, %26 : vector<32x128xf32>
    %28 = vector.broadcast %25 : vector<1x128xf32> to vector<32x128xf32>
    %29 = arith.addf %27, %28 : vector<32x128xf32>
    %cst_24 = arith.constant 0.000000e+00 : f32
    %30 = vector.broadcast %cst_24 : f32 to vector<32x128xf32>
    %31 = arith.maximumf %29, %30 : vector<32x128xf32>
    %cst_25 = arith.constant 0.000000e+00 : f32
    %32 = vector.broadcast %cst_25 : f32 to vector<2x1x128xf32>
    %c0_26 = arith.constant 0 : index
    %c0_27 = arith.constant 0 : index
    %c0_28 = arith.constant 0 : index
    %33 = vector.load %arg9[%c0_26, %c0_27, %c0_28] : memref<2x18x128xf32, #tpu.memory_space<vmem>>, vector<2x1x128xf32>
    tpu.vector_store %arg9[%c0_26, %c0_27, %c0_28], %32 {strides = array<i32>} : memref<2x18x128xf32, #tpu.memory_space<vmem>>, vector<2x1x128xf32>,
    %c0_29 = arith.constant 0 : index
    %c17 = arith.constant 17 : index
    %c0_30 = arith.constant 0 : index
    %34 = vector.load %arg9[%c0_29, %c17, %c0_30] : memref<2x18x128xf32, #tpu.memory_space<vmem>>, vector<2x1x128xf32>
    tpu.vector_store %arg9[%c0_29, %c17, %c0_30], %32 {strides = array<i32>} : memref<2x18x128xf32, #tpu.memory_space<vmem>>, vector<2x1x128xf32>,
    %35 = vector.shape_cast %31 : vector<32x128xf32> to vector<2x16x128xf32>
    %c0_31 = arith.constant 0 : index
    %c1_32 = arith.constant 1 : index
    %c0_33 = arith.constant 0 : index
    %36 = vector.load %arg9[%c0_31, %c1_32, %c0_33] : memref<2x18x128xf32, #tpu.memory_space<vmem>>, vector<2x16x128xf32>
    tpu.vector_store %arg9[%c0_31, %c1_32, %c0_33], %35 {strides = array<i32>} : memref<2x18x128xf32, #tpu.memory_space<vmem>>, vector<2x16x128xf32>,
    %c0_34 = arith.constant 0 : index
    %c0_35 = arith.constant 0 : index
    %c0_36 = arith.constant 0 : index
    %37 = vector.load %arg9[%c0_34, %c0_35, %c0_36] : memref<2x18x128xf32, #tpu.memory_space<vmem>>, vector<2x16x128xf32>
    %c0_37 = arith.constant 0 : index
    %c1_38 = arith.constant 1 : index
    %c0_39 = arith.constant 0 : index
    %38 = vector.load %arg9[%c0_37, %c1_38, %c0_39] : memref<2x18x128xf32, #tpu.memory_space<vmem>>, vector<2x16x128xf32>
    %c0_40 = arith.constant 0 : index
    %c2 = arith.constant 2 : index
    %c0_41 = arith.constant 0 : index
    %39 = vector.load %arg9[%c0_40, %c2, %c0_41] : memref<2x18x128xf32, #tpu.memory_space<vmem>>, vector<2x16x128xf32>
    %40 = tpu.concatenate %37, %38, %39 in 2 : vector<2x16x128xf32>, vector<2x16x128xf32>, vector<2x16x128xf32> -> vector<2x16x384xf32>
    %41 = vector.shape_cast %40 : vector<2x16x384xf32> to vector<32x384xf32>
    %c0_42 = arith.constant 0 : index
    %c0_43 = arith.constant 0 : index
    %42 = vector.load %arg4[%c0_42, %c0_43] : memref<384x128xf32, #tpu.memory_space<vmem>>, vector<384x128xf32>
    %cst_44 = arith.constant dense<0.000000e+00> : vector<32x128xf32>
    %43 = tpu.matmul %41, %42, %cst_44 {dimension_numbers = #tpu.dot_dimension_numbers<[1], [0], [0], [1], [0, 0, 1, 1], [], []>} : vector<32x384xf32>, vector<384x128xf32>, vector<32x128xf32> -> vector<32x128xf32>
    %c0_45 = arith.constant 0 : index
    %c0_46 = arith.constant 0 : index
    %44 = vector.load %arg5[%c0_45, %c0_46] : memref<1x128xf32, #tpu.memory_space<vmem>>, vector<1x128xf32>
    %c0_47 = arith.constant 0 : index
    %c0_48 = arith.constant 0 : index
    %45 = vector.load %arg6[%c0_47, %c0_48] : memref<1x128xf32, #tpu.memory_space<vmem>>, vector<1x128xf32>
    %cst_49 = arith.constant dense<0.000000e+00> : vector<128xf32>
    %46 = vector.multi_reduction <add>, %43, %cst_49 [0] : vector<32x128xf32> to vector<128xf32>
    %47 = vector.shape_cast %46 : vector<128xf32> to vector<1x128xf32>
    %c0_50 = arith.constant 0 : index
    %c0_51 = arith.constant 0 : index
    %48 = vector.load %arg10[%c0_50, %c0_51] : memref<2x128xf32, #tpu.memory_space<vmem>>, vector<1x128xf32>
    tpu.vector_store %arg10[%c0_50, %c0_51], %47 {strides = array<i32>} : memref<2x128xf32, #tpu.memory_space<vmem>>, vector<1x128xf32>,
    %49 = arith.mulf %43, %43 : vector<32x128xf32>
    %cst_52 = arith.constant dense<0.000000e+00> : vector<128xf32>
    %50 = vector.multi_reduction <add>, %49, %cst_52 [0] : vector<32x128xf32> to vector<128xf32>
    %51 = vector.shape_cast %50 : vector<128xf32> to vector<1x128xf32>
    %c1_53 = arith.constant 1 : index
    %c0_54 = arith.constant 0 : index
    %52 = vector.load %arg10[%c1_53, %c0_54] : memref<2x128xf32, #tpu.memory_space<vmem>>, vector<1x128xf32>
    tpu.vector_store %arg10[%c1_53, %c0_54], %51 {strides = array<i32>} : memref<2x128xf32, #tpu.memory_space<vmem>>, vector<1x128xf32>,
    %c0_55 = arith.constant 0 : index
    %c0_56 = arith.constant 0 : index
    %53 = vector.load %arg10[%c0_55, %c0_56] : memref<2x128xf32, #tpu.memory_space<vmem>>, vector<2x128xf32>
    %c0_57 = arith.constant 0 : index
    %c0_58 = arith.constant 0 : index
    %54 = vector.load %arg7[%c0_57, %c0_58] : memref<128x128xf32, #tpu.memory_space<vmem>>, vector<128x128xf32>
    %cst_59 = arith.constant dense<0.000000e+00> : vector<2x128xf32>
    %55 = tpu.matmul %53, %54, %cst_59 {dimension_numbers = #tpu.dot_dimension_numbers<[1], [0], [0], [1], [0, 0, 1, 1], [], []>} : vector<2x128xf32>, vector<128x128xf32>, vector<2x128xf32> -> vector<2x128xf32>
    %c0_60 = arith.constant 0 : index
    %c0_61 = arith.constant 0 : index
    %56 = vector.load %arg10[%c0_60, %c0_61] : memref<2x128xf32, #tpu.memory_space<vmem>>, vector<2x128xf32>
    tpu.vector_store %arg10[%c0_60, %c0_61], %55 {strides = array<i32>} : memref<2x128xf32, #tpu.memory_space<vmem>>, vector<2x128xf32>,
    %c0_62 = arith.constant 0 : index
    %c0_63 = arith.constant 0 : index
    %57 = vector.load %arg10[%c0_62, %c0_63] : memref<2x128xf32, #tpu.memory_space<vmem>>, vector<1x128xf32>
    %c1_64 = arith.constant 1 : index
    %c0_65 = arith.constant 0 : index
    %58 = vector.load %arg10[%c1_64, %c0_65] : memref<2x128xf32, #tpu.memory_space<vmem>>, vector<1x128xf32>
    %59 = arith.mulf %57, %57 : vector<1x128xf32>
    %60 = arith.subf %58, %59 : vector<1x128xf32>
    %cst_66 = arith.constant 9.99999974E-6 : f32
    %61 = vector.broadcast %cst_66 : f32 to vector<1x128xf32>
    %62 = arith.addf %60, %61 : vector<1x128xf32>
    %63 = math.rsqrt %62 : vector<1x128xf32>
    %64 = arith.mulf %44, %63 : vector<1x128xf32>
    %65 = arith.mulf %57, %64 : vector<1x128xf32>
    %66 = arith.subf %45, %65 : vector<1x128xf32>
    %67 = vector.broadcast %64 : vector<1x128xf32> to vector<32x128xf32>
    %68 = arith.mulf %43, %67 : vector<32x128xf32>
    %69 = vector.broadcast %66 : vector<1x128xf32> to vector<32x128xf32>
    %70 = arith.addf %68, %69 : vector<32x128xf32>
    %cst_67 = arith.constant 0.000000e+00 : f32
    %71 = vector.broadcast %cst_67 : f32 to vector<32x128xf32>
    %72 = arith.maximumf %70, %71 : vector<32x128xf32>
    %c0_68 = arith.constant 0 : index
    %c0_69 = arith.constant 0 : index
    %73 = vector.load %arg8[%c0_68, %c0_69] : memref<32x128xf32, #tpu.memory_space<vmem>>, vector<32x128xf32>
    tpu.vector_store %arg8[%c0_68, %c0_69], %72 {strides = array<i32>} : memref<32x128xf32, #tpu.memory_space<vmem>>, vector<32x128xf32>,
    return
  }
}

</mosaic_0001>

<bundles_post_ra>
// kernel: tpu_custom_call.1
= control target key start
LH: loop header
LB: loop body
LE: loop exit
PB: predicated region body
PF: predicated region fallthrough
CT: control target
= control target key end

     0   :  { %13 = vsyncpa [#allocation5], 0  ;;  %s1722_s0 = inlined_call_operand.hbm [shape: f32[32,384], index: 0, kind: input, shape index: {}]   ;;  %s1723_s1 = inlined_call_operand.hbm [shape: f32[384,128], index: 1, kind: input, shape index: {}]   ;;  %s1724_s2 = inlined_call_operand.vmem [shape: f32[1,128], index: 2, kind: input, shape index: {}]   ;;  %s1725_s3 = inlined_call_operand.vmem [shape: f32[1,128], index: 3, kind: input, shape index: {}]   ;;  %s1726_s4 = inlined_call_operand.hbm [shape: f32[384,128], index: 4, kind: input, shape index: {}]   ;;  %s1727_s5 = inlined_call_operand.vmem [shape: f32[1,128], index: 5, kind: input, shape index: {}]   ;;  %s1728_s6 = inlined_call_operand.vmem [shape: f32[1,128], index: 6, kind: input, shape index: {}]   ;;  %s1729_s7 = inlined_call_operand.hbm [shape: f32[128,128], index: 7, kind: input, shape index: {}]   ;;  %s1730_s8 = inlined_call_operand.hbm [shape: f32[32,128], index: 8, kind: output, shape index: {}]  }
   0x1   :  { %14 = vsyncpa [#allocation8], 0 }
   0x2   :  { %15 = vsyncpa [#allocation11], 0 }
   0x3   :  { %16 = vsyncpa [#allocation6], 0  ;;  %s1488_s27 = smov [#allocation7]   ;;  %s1370_s9 = scalar_lea.hbm %s1723_s1, 6144 }
   0x4   :  { %s34_s28 = sshll.u32 %s1488_s27, 4  ;;  %p1371_p0 = scmp.ne.s32.totalorder %s1723_s1, %s1370_s9  ;;  %s35_s28 = int_to_ptr.vmem [resolvable:$true] %s34_s28 }
   0x5   :  { %p1374_p1 = scmp.lt.u32.totalorder %s1370_s9, %s1723_s1 }
   0x7   :  { %p1376_p2 = pnand %p1374_p1, %p1371_p0 }
   0x9   :  { %1379 = shalt.err (!%p1376_p2)
}
   0xa   :  { %s1380_s14 = scalar_lea.vmem %s35_s28, 6144  ;;  %p1385_p4 = scmp.lt.s32.totalorder %s35_s28, %s35_s28 }
   0xb   :  { %p1381_p3 = scmp.ne.s32.totalorder %s35_s28, %s1380_s14  ;;  %p1386_p5 = scmp.lt.s32.totalorder %s1380_s14, %s1380_s14 }
   0xd   :  { %p1387_p6 = por %p1386_p5, %p1385_p4 }
   0xf   :  { %p1388_p7 = pnand %p1387_p6, %p1381_p3 }
  0x11   :  { %1391 = shalt.err (!%p1388_p7)
}
  0x12   :  { %s1489_s15 = smov 128   ;;  %s1490_s16 = smov 8  }
  0x13   :  { %40 = dma.hbm_to_vmem [thread:$0]  %s1723_s1, 6144, %s35_s28, [#allocation8], %s1489_s15, %s1489_s15, %s1490_s16  }
  0x14   :  { %s1491_s19 = smov [#allocation4]   ;;  %s1392_s23 = scalar_lea.hbm %s1722_s0, 1536 }
  0x15   :  { %s22_s20 = sshll.u32 %s1491_s19, 4  ;;  %p1393_p8 = scmp.ne.s32.totalorder %s1722_s0, %s1392_s23  ;;  %s23_s20 = int_to_ptr.vmem [resolvable:$true] %s22_s20 }
  0x16   :  { %p1396_p9 = scmp.lt.u32.totalorder %s1392_s23, %s1722_s0 }
  0x18   :  { %p1398_p10 = pnand %p1396_p9, %p1393_p8 }
  0x1a   :  { %1401 = shalt.err (!%p1398_p10)
}
  0x1b   :  { %s1402_s29 = scalar_lea.vmem %s23_s20, 1536  ;;  %p1407_p12 = scmp.lt.s32.totalorder %s23_s20, %s23_s20 }
  0x1c   :  { %p1403_p11 = scmp.ne.s32.totalorder %s23_s20, %s1402_s29  ;;  %p1408_p13 = scmp.lt.s32.totalorder %s1402_s29, %s1402_s29 }
  0x1e   :  { %p1409_p0 = por %p1408_p13, %p1407_p12 }
  0x20   :  { %p1410_p1 = pnand %p1409_p0, %p1403_p11 }
  0x22   :  { %1413 = shalt.err (!%p1410_p1)
}
  0x23   :  { %s1492_s1 = smov 384   ;;  %s1493_s28 = smov 24  }
  0x24   :  { %28 = dma.hbm_to_vmem [thread:$0]  %s1722_s0, 1536, %s23_s20, [#allocation5], %s1492_s1, %s1492_s1, %s1493_s28  }
  0x25   :  { %s1494_s10 = smov [#allocation9]   ;;  %s1495_s12 = smov [#allocation10]  }
  0x26   :  { %s50_s11 = sshll.u32 %s1494_s10, 4  ;;  %s66_s13 = sshll.u32 %s1495_s12, 4  ;;  %s51_s11 = int_to_ptr.vmem [resolvable:$true] %s50_s11  ;;  %s1572_s13 = int_to_ptr.vmem [resolvable:$true] %s66_s13 }
  0x27   :  { %s1414_s18 = scalar_lea.hbm %s1726_s4, 6144 }
  0x28   :  { %p1415_p2 = scmp.ne.s32.totalorder %s1726_s4, %s1414_s18  ;;  %p1418_p3 = scmp.lt.u32.totalorder %s1414_s18, %s1726_s4 }
  0x2a   :  { %p1420_p4 = pnand %p1418_p3, %p1415_p2 }
  0x2c   :  { %1423 = shalt.err (!%p1420_p4)
}
  0x2d   :  { %s1424_s0 = scalar_lea.vmem %s51_s11, 6144  ;;  %p1429_p6 = scmp.lt.s32.totalorder %s51_s11, %s51_s11 }
  0x2e   :  { %p1425_p5 = scmp.ne.s32.totalorder %s51_s11, %s1424_s0  ;;  %p1430_p7 = scmp.lt.s32.totalorder %s1424_s0, %s1424_s0 }
  0x30   :  { %p1431_p8 = por %p1430_p7, %p1429_p6 }
  0x32   :  { %p1432_p9 = pnand %p1431_p8, %p1425_p5 }
  0x34   :  { %1435 = shalt.err (!%p1432_p9)
}
  0x35   :  { %56 = dma.hbm_to_vmem [thread:$0]  %s1726_s4, 6144, %s51_s11, [#allocation8], %s1489_s15, %s1489_s15, %s1490_s16  }
  0x36   :  { %s1436_s27 = scalar_lea.hbm %s1729_s7, 2048 }
  0x37   :  { %p1437_p10 = scmp.ne.s32.totalorder %s1729_s7, %s1436_s27  ;;  %p1440_p11 = scmp.lt.u32.totalorder %s1436_s27, %s1729_s7 }
  0x39   :  { %p1442_p12 = pnand %p1440_p11, %p1437_p10 }
  0x3b   :  { %1445 = shalt.err (!%p1442_p12)
}
  0x3c   :  { %s1446_s9 = scalar_lea.vmem %s1572_s13, 2048  ;;  %p1451_p0 = scmp.lt.s32.totalorder %s1572_s13, %s1572_s13 }
  0x3d   :  { %p1447_p13 = scmp.ne.s32.totalorder %s1572_s13, %s1446_s9  ;;  %p1452_p1 = scmp.lt.s32.totalorder %s1446_s9, %s1446_s9 }
  0x3f   :  { %p1453_p2 = por %p1452_p1, %p1451_p0 }
  0x41   :  { %p1454_p3 = pnand %p1453_p2, %p1447_p13 }
  0x43   :  { %1457 = shalt.err (!%p1454_p3)
}
  0x44   :  { %72 = dma.hbm_to_vmem [thread:$0]  %s1729_s7, 2048, %s1572_s13, [#allocation11], %s1489_s15, %s1489_s15, %s1490_s16  }
  0x45   :  { %1480 = dma.done.wait [#allocation5], 1536  }
  0x46   :  { %1481 = vsyncadd [#allocation5], 4294965760 }
  0x47   :  { %1482 = dma.done.wait [#allocation8], 12288  }
  0x48   :  { %1483 = vsyncadd [#allocation8], 4294955008 }
  0x49   :  { %1484 = dma.done.wait [#allocation11], 2048  }
  0x4a   :  { %1485 = vsyncadd [#allocation11], 4294965248  ;;  %v113_v0 = vld [vmem:[#allocation7 + $0x80] sm:$0xff]  ;;  %v114_v1 = vld [vmem:[#allocation7 + $0x88] sm:$0xff]  ;;  %vm1497_vm0 = vmmov 0   ;;  %s1499_s18 = smov [#allocation12]  }
  0x4b   :  { %v97_v2 = vld [vmem:[#allocation7] sm:$0xff]  ;;  %v1178_v3 = vpack.c.bf16 %v114_v1, %v113_v0  ;;  %v98_v4 = vld [vmem:[#allocation7 + $0x8] sm:$0xff]  ;;  %v115_v9 = vld [vmem:[#allocation7 + $0x90] sm:$0xff]  ;;  %s856_s19 = sshll.u32 %s1499_s18, 4  ;;  %s857_s19 = int_to_ptr.vmem [resolvable:$true] %s856_s19 }
  0x4c   :  { %v129_v5 = vld [vmem:[#allocation7 + $0x100] sm:$0xff]  ;;  %v130_v6 = vld [vmem:[#allocation7 + $0x108] sm:$0xff]  ;;  %v1180_v7 = vpack.c.bf16 %v98_v4, %v97_v2  ;;  %v116_v10 = vld [vmem:[#allocation7 + $0x98] sm:$0xff]  ;;  %p1463_p5 = scmp.lt.s32.totalorder %s857_s19, %s857_s19 }
  0x4d   :  { %v1210_v8 = vpack.c.bf16 %v130_v6, %v129_v5  ;;  %v99_v11 = vld [vmem:[#allocation7 + $0x10] sm:$0xff]  ;;  %1179 = vmatprep.subr.bf16.mxu0 %v1178_v3  ;;  %v1182_v12 = vpack.c.bf16 %v116_v10, %v115_v9  ;;  %v100_v13 = vld [vmem:[#allocation7 + $0x18] sm:$0xff]  ;;  %v117_v18 = vld [vmem:[#allocation7 + $0xa0] sm:$0xff] }
  0x4e   :  { %v131_v14 = vld [vmem:[#allocation7 + $0x110] sm:$0xff]  ;;  %v132_v15 = vld [vmem:[#allocation7 + $0x118] sm:$0xff]  ;;  %1181 = vmatpush3.bf16.msra.mxu0 %v1180_v7  ;;  %v1184_v16 = vpack.c.bf16 %v100_v13, %v99_v11  ;;  %v118_v19 = vld [vmem:[#allocation7 + $0xa8] sm:$0xff] }
  0x4f   :  { %1211 = vmatprep.subr.bf16.mxu1 %v1210_v8  ;;  %v1214_v17 = vpack.c.bf16 %v132_v15, %v131_v14  ;;  %v101_v20 = vld [vmem:[#allocation7 + $0x20] sm:$0xff]  ;;  %1183 = vmatprep.subr.bf16.mxu0 %v1182_v12  ;;  %v1186_v21 = vpack.c.bf16 %v118_v19, %v117_v18  ;;  %v102_v22 = vld [vmem:[#allocation7 + $0x28] sm:$0xff]  ;;  %v119_v26 = vld [vmem:[#allocation7 + $0xb0] sm:$0xff] }
  0x50   :  { %1213 = vmatpush3.bf16.msra.mxu1 %v1210_v8  ;;  %v133_v23 = vld [vmem:[#allocation7 + $0x120] sm:$0xff]  ;;  %v134_v24 = vld [vmem:[#allocation7 + $0x128] sm:$0xff]  ;;  %v120_v27 = vld [vmem:[#allocation7 + $0xb8] sm:$0xff]  ;;  %v1188_v30 = vpack.c.bf16 %v102_v22, %v101_v20 }
  0x51   :  { %1215 = vmatprep.subr.bf16.mxu1 %v1214_v17  ;;  %v1218_v25 = vpack.c.bf16 %v134_v24, %v133_v23  ;;  %v135_v28 = vld [vmem:[#allocation7 + $0x130] sm:$0xff]  ;;  %v136_v29 = vld [vmem:[#allocation7 + $0x138] sm:$0xff]  ;;  %v1190_v31 = vpack.c.bf16 %v120_v27, %v119_v26  ;;  %v121_v35 = vld [vmem:[#allocation7 + $0xc0] sm:$0xff]  ;;  %v1496_v23 = vmov 0.0|0.0  }
  0x52   :  { %1185 = vmatpush3.bf16.msra.mxu0 %v1184_v16  ;;  %v103_v32 = vld [vmem:[#allocation7 + $0x30] sm:$0xff]  ;;  %v104_v33 = vld [vmem:[#allocation7 + $0x38] sm:$0xff]  ;;  %v1222_v34 = vpack.c.bf16 %v136_v29, %v135_v28  ;;  %v122_v36 = vld [vmem:[#allocation7 + $0xc8] sm:$0xff] }
  0x53   :  { %1187 = vmatprep.subr.bf16.mxu0 %v1186_v21  ;;  %v137_v37 = vld [vmem:[#allocation7 + $0x140] sm:$0xff]  ;;  %v138_v38 = vld [vmem:[#allocation7 + $0x148] sm:$0xff]  ;;  %v1192_v39 = vpack.c.bf16 %v104_v33, %v103_v32  ;;  %v1194_v40 = vpack.c.bf16 %v122_v36, %v121_v35  ;;  %v123_v44 = vld [vmem:[#allocation7 + $0xd0] sm:$0xff] }
  0x54   :  { %1217 = vmatpush3.bf16.msra.mxu1 %v1214_v17  ;;  %v105_v41 = vld [vmem:[#allocation7 + $0x40] sm:$0xff]  ;;  %v106_v42 = vld [vmem:[#allocation7 + $0x48] sm:$0xff]  ;;  %v1226_v43 = vpack.c.bf16 %v138_v38, %v137_v37  ;;  %v124_v45 = vld [vmem:[#allocation7 + $0xd8] sm:$0xff] }
  0x55   :  { %1219 = vmatprep.subr.bf16.mxu1 %v1218_v25  ;;  %v139_v46 = vld [vmem:[#allocation7 + $0x150] sm:$0xff]  ;;  %v140_v47 = vld [vmem:[#allocation7 + $0x158] sm:$0xff]  ;;  %v1196_v48 = vpack.c.bf16 %v106_v42, %v105_v41  ;;  %v86_v49 = vld [vmem:[#allocation4 + $0x8] sm:$0xff]  ;;  %v1198_v51 = vpack.c.bf16 %v124_v45, %v123_v44  ;;  %v1498_v45 = vmov 0.0  }
  0x56   :  { %1189 = vmatpush3.bf16.msra.mxu0 %v1188_v30  ;;  %v87_v50 = vld [vmem:[#allocation4 + $0x10] sm:$0xff]  ;;  %v108_v53 = vld [vmem:[#allocation7 + $0x58] sm:$0xff]  ;;  %v1230_v54 = vpack.c.bf16 %v140_v47, %v139_v46  ;;  %v125_v55 = vld [vmem:[#allocation7 + $0xe0] sm:$0xff]  ;;  %209 = vmatprep.mubr.f32.mxu0 %v86_v49  ;;  %462 = vst [vmem:[#allocation2] sm:$0x1] %v1498_v45 }
  0x57   :  { %1191 = vmatprep.subr.bf16.mxu0 %v1190_v31  ;;  %v107_v52 = vld [vmem:[#allocation7 + $0x50] sm:$0xff]  ;;  %v126_v56 = vld [vmem:[#allocation7 + $0xe8] sm:$0xff]  ;;  %v141_v57 = vld [vmem:[#allocation7 + $0x160] sm:$0xff]  ;;  %1064 = vmatprep.mubr.f32.mxu1 %v87_v50  ;;  %463 = vst [vmem:[#allocation2 + $0x18] sm:$0x1] %v1498_v45 }
  0x58   :  { %1221 = vmatpush3.bf16.msra.mxu1 %v1218_v25  ;;  %v142_v58 = vld [vmem:[#allocation7 + $0x168] sm:$0xff]  ;;  %v1200_v59 = vpack.c.bf16 %v108_v53, %v107_v52  ;;  %v1202_v60 = vpack.c.bf16 %v126_v56, %v125_v55  ;;  %v109_v61 = vld [vmem:[#allocation7 + $0x60] sm:$0xff]  ;;  %v127_v0 = vld [vmem:[#allocation7 + $0xf0] sm:$0xff]  ;;  %464 = vst [vmem:[#allocation2 + $0x11] sm:$0x1] %v1498_v45 }
  0x59   :  { %1223 = vmatprep.subr.bf16.mxu1 %v1222_v34  ;;  %v110_v62 = vld [vmem:[#allocation7 + $0x68] sm:$0xff]  ;;  %v1234_v63 = vpack.c.bf16 %v142_v58, %v141_v57  ;;  %v128_v1 = vld [vmem:[#allocation7 + $0xf8] sm:$0xff]  ;;  %v143_v2 = vld [vmem:[#allocation7 + $0x170] sm:$0xff]  ;;  %465 = vst [vmem:[#allocation2 + $0x29] sm:$0x1] %v1498_v45 }
  0x5a   :  { %1193 = vmatpush3.bf16.msra.mxu0 %v1192_v39  ;;  %v144_v3 = vld [vmem:[#allocation7 + $0x178] sm:$0xff]  ;;  %v1204_v4 = vpack.c.bf16 %v110_v62, %v109_v61  ;;  %v1206_v5 = vpack.c.bf16 %v128_v1, %v127_v0  ;;  %v111_v6 = vld [vmem:[#allocation7 + $0x70] sm:$0xff]  ;;  %v85_v10 = vld [vmem:[#allocation4] sm:$0xff] }
  0x5b   :  { %1195 = vmatprep.subr.bf16.mxu0 %v1194_v40  ;;  %v112_v7 = vld [vmem:[#allocation7 + $0x78] sm:$0xff]  ;;  %v1238_v8 = vpack.c.bf16 %v144_v3, %v143_v2  ;;  %v90_v11 = vld [vmem:[#allocation4 + $0x28] sm:$0xff]  ;;  %v89_v12 = vld [vmem:[#allocation4 + $0x20] sm:$0xff] }
  0x5c   :  { %1225 = vmatpush3.bf16.msra.mxu1 %v1222_v34  ;;  %v1208_v9 = vpack.c.bf16 %v112_v7, %v111_v6  ;;  %v93_v13 = vld [vmem:[#allocation4 + $0x40] sm:$0xff]  ;;  %v88_v14 = vld [vmem:[#allocation4 + $0x18] sm:$0xff]  ;;  %v91_v17 = vld [vmem:[#allocation4 + $0x30] sm:$0xff] }
  0x5d   :  { %1227 = vmatprep.subr.bf16.mxu1 %v1226_v43  ;;  %v92_v15 = vld [vmem:[#allocation4 + $0x38] sm:$0xff]  ;;  %v95_v18 = vld [vmem:[#allocation4 + $0x50] sm:$0xff]  ;;  %v94_v19 = vld [vmem:[#allocation4 + $0x48] sm:$0xff] }
  0x5e   :  { %1197 = vmatpush3.bf16.msra.mxu0 %v1196_v48  ;;  %v96_v16 = vld [vmem:[#allocation4 + $0x58] sm:$0xff]  ;;  %v342_v20 = vld [vmem:[#allocation10] sm:$0xff]  ;;  %v343_v21 = vld [vmem:[#allocation10 + $0x8] sm:$0xff] }
  0x5f   :  { %1199 = vmatprep.subr.bf16.mxu0 %v1198_v51  ;;  %v1609_v22 = vpack.c.bf16 %v343_v21, %v342_v20  ;;  %v344_v24 = vld [vmem:[#allocation10 + $0x10] sm:$0xff]  ;;  %v345_v25 = vld [vmem:[#allocation10 + $0x18] sm:$0xff]  ;;  %v346_v27 = vld [vmem:[#allocation10 + $0x20] sm:$0xff] }
  0x60   :  { %1229 = vmatpush3.bf16.msra.mxu1 %v1226_v43  ;;  %v1614_v26 = vpack.c.bf16 %v345_v25, %v344_v24  ;;  %v347_v28 = vld [vmem:[#allocation10 + $0x28] sm:$0xff]  ;;  %v348_v30 = vld [vmem:[#allocation10 + $0x30] sm:$0xff]  ;;  %v349_v31 = vld [vmem:[#allocation10 + $0x38] sm:$0xff] }
  0x61   :  { %1231 = vmatprep.subr.bf16.mxu1 %v1230_v54  ;;  %v1618_v29 = vpack.c.bf16 %v347_v28, %v346_v27  ;;  %v1622_v32 = vpack.c.bf16 %v349_v31, %v348_v30  ;;  %v350_v33 = vld [vmem:[#allocation10 + $0x40] sm:$0xff]  ;;  %v351_v34 = vld [vmem:[#allocation10 + $0x48] sm:$0xff]  ;;  %v352_v36 = vld [vmem:[#allocation10 + $0x50] sm:$0xff] }
  0x62   :  { %1201 = vmatpush3.bf16.msra.mxu0 %v1200_v59  ;;  %v1626_v35 = vpack.c.bf16 %v351_v34, %v350_v33  ;;  %v353_v37 = vld [vmem:[#allocation10 + $0x58] sm:$0xff]  ;;  %v354_v39 = vld [vmem:[#allocation10 + $0x60] sm:$0xff]  ;;  %v355_v40 = vld [vmem:[#allocation10 + $0x68] sm:$0xff] }
  0x63   :  { %1203 = vmatprep.subr.bf16.mxu0 %v1202_v60  ;;  %v1630_v38 = vpack.c.bf16 %v353_v37, %v352_v36  ;;  %v1634_v41 = vpack.c.bf16 %v355_v40, %v354_v39  ;;  %v356_v42 = vld [vmem:[#allocation10 + $0x70] sm:$0xff]  ;;  %v357_v43 = vld [vmem:[#allocation10 + $0x78] sm:$0xff]  ;;  %v498_v28 = vld [vmem:[#allocation9 + $0x80] sm:$0xff] }
  0x64   :  { %1233 = vmatpush3.bf16.msra.mxu1 %v1230_v54  ;;  %v1637_v44 = vpack.c.bf16 %v357_v43, %v356_v42  ;;  %v499_v30 = vld [vmem:[#allocation9 + $0x88] sm:$0xff]  ;;  %v514_v33 = vld [vmem:[#allocation9 + $0x100] sm:$0xff]  ;;  %v500_v42 = vld [vmem:[#allocation9 + $0x90] sm:$0xff] }
  0x65   :  { %1235 = vmatprep.subr.bf16.mxu1 %v1234_v63  ;;  %v1266_v31 = vpack.c.bf16 %v499_v30, %v498_v28  ;;  %v515_v34 = vld [vmem:[#allocation9 + $0x108] sm:$0xff]  ;;  %v482_v36 = vld [vmem:[#allocation9] sm:$0xff]  ;;  %v501_v43 = vld [vmem:[#allocation9 + $0x98] sm:$0xff] }
  0x66   :  { %1205 = vmatpush3.bf16.msra.mxu0 %v1204_v4  ;;  %v1298_v37 = vpack.c.bf16 %v515_v34, %v514_v33  ;;  %v483_v39 = vld [vmem:[#allocation9 + $0x8] sm:$0xff]  ;;  %v492_v28 = vld [vmem:[#allocation9 + $0x50] sm:$0xff]  ;;  %v493_v30 = vld [vmem:[#allocation9 + $0x58] sm:$0xff] }
  0x67   :  { %1207 = vmatprep.subr.bf16.mxu0 %v1206_v5  ;;  %v1268_v40 = vpack.c.bf16 %v483_v39, %v482_v36  ;;  %v1288_v33 = vpack.c.bf16 %v493_v30, %v492_v28  ;;  %v510_v34 = vld [vmem:[#allocation9 + $0xe0] sm:$0xff]  ;;  %v511_v36 = vld [vmem:[#allocation9 + $0xe8] sm:$0xff] }
  0x68   :  { %1237 = vmatpush3.bf16.msra.mxu1 %v1234_v63  ;;  %v1290_v39 = vpack.c.bf16 %v511_v36, %v510_v34 }
  0x69   :  { %1239 = vmatprep.subr.bf16.mxu1 %v1238_v8 }
  0x6a   :  { %1209 = vmatpush3.bf16.msra.mxu0 %v1208_v9 }
  0x6b   :  { %1242 = vmatprep.subr.bf16.mxu0 %v1496_v23 }
  0x6c   :  { %1241 = vmatpush3.bf16.msra.mxu1 %v1238_v8 }
  0x6d   :  { %210 = vmatmul.mubr.f32.vlgmr.msra.gmra.mrb[0].mxu0 %v85_v10  ;;  %1267 = vmatprep.subr.bf16.mxu1 %v1266_v31 }
  0x6e   :  { %214 = vmatprep.mubr.f32.mxu0 %v89_v12  ;;  %1244 = vmatpush3.bf16.msra.mxu0 %v1609_v22 }
  0x6f   :  { %1065 = vmatmul.mubr.f32.vlgmr.msra.gmra.mrb[0].mxu1 %v90_v11  ;;  %1245 = vmatprep.subr.bf16.mxu0 %v1496_v23 }
  0x70   :  { %1067 = vmatprep.mubr.f32.mxu1 %v93_v13  ;;  %1269 = vmatpush3.bf16.msra.mxu1 %v1268_v40  ;;  %v527_v40 = vld [vmem:[#allocation9 + $0x168] sm:$0xff] }
  0x71   :  { %215 = vmatmul.mubr.f32.gmra.mrb[2].mxu0 %v88_v14 }
  0x72   :  { %219 = vmatprep.mubr.f32.mxu0 %v92_v15  ;;  %1247 = vmatpush3.bf16.msra.mxu0 %v1614_v26 }
  0x73   :  { %1068 = vmatmul.mubr.f32.gmra.mrb[2].mxu1 %v96_v16  ;;  %1248 = vmatprep.subr.bf16.mxu0 %v1496_v23 }
  0x75   :  { %220 = vmatmul.mubr.f32.gmra.mrb[4].mxu0 %v91_v17 }
  0x76   :  { %224 = vmatprep.mubr.f32.mxu0 %v95_v18  ;;  %1250 = vmatpush3.bf16.msra.mxu0 %v1618_v29 }
  0x77   :  { %1251 = vmatprep.subr.bf16.mxu0 %v1496_v23 }
  0x79   :  { %225 = vmatmul.mubr.f32.gmra.mrb[6].mxu0 %v94_v19 }
  0x7a   :  { %1253 = vmatpush3.bf16.msra.mxu0 %v1622_v32  ;;  %1102 = vmatprep.mubr.msk.f32.mxu0 %vm1497_vm0, %v1498_v45 }
  0x7b   :  { %1254 = vmatprep.subr.bf16.mxu0 %v1496_v23 }
  0x7e   :  { %1256 = vmatpush3.bf16.msra.mxu0 %v1626_v35 }
  0x7f   :  { %1257 = vmatprep.subr.bf16.mxu0 %v1496_v23 }
  0x82   :  { %1259 = vmatpush3.bf16.msra.mxu0 %v1630_v38 }
  0x83   :  { %1260 = vmatprep.subr.bf16.mxu0 %v1496_v23 }
  0x86   :  { %1262 = vmatpush3.bf16.msra.mxu0 %v1634_v41 }
  0x87   :  { %1263 = vmatprep.subr.bf16.mxu0 %v1496_v23 }
  0x8a   :  { %1265 = vmatpush3.bf16.msra.mxu0 %v1637_v44 }
  0x8b   :  { %1299 = vmatprep.subr.bf16.mxu0 %v1298_v37 }
 0x140   :  { %v902_v46 = vpop.f32.mrb[0].mxu0 }
 0x141   :  { %v903_v47 = vpop.f32.mrb[1].mxu0 }
 0x142   :  { %v1066_v48 = vpop.f32.mrb[0].mxu1  ;;  %v904_v49 = vadd.f32 %v903_v47, %v902_v46  ;;  %v1270_v46 = vpack.c.bf16 %v501_v43, %v500_v42  ;;  %v516_v47 = vld [vmem:[#allocation9 + $0x110] sm:$0xff]  ;;  %v494_v42 = vld [vmem:[#allocation9 + $0x60] sm:$0xff]  ;;  %v495_v43 = vld [vmem:[#allocation9 + $0x68] sm:$0xff] }
 0x143   :  { %v296_v50 = vpop.f32.mrb[1].mxu1 }
 0x144   :  { %v1647_v51 = vadd.f32 %v904_v49, %v296_v50  ;;  %v905_v52 = vpop.f32.mrb[2].mxu0  ;;  %v484_v49 = vld [vmem:[#allocation9 + $0x10] sm:$0xff]  ;;  %1271 = vmatprep.subr.bf16.mxu1 %v1270_v46 }
 0x145   :  { %v906_v53 = vpop.f32.mrb[3].mxu0 }
 0x146   :  { %v1069_v54 = vpop.f32.mrb[2].mxu1  ;;  %v907_v55 = vadd.f32 %v906_v53, %v905_v52  ;;  %v327_v1 = vmul.f32 %v1647_v51, %v1647_v51  ;;  %v485_v52 = vld [vmem:[#allocation9 + $0x18] sm:$0xff] }
 0x147   :  { %v306_v56 = vpop.f32.mrb[3].mxu1  ;;  %v1272_v53 = vpack.c.bf16 %v485_v52, %v484_v49  ;;  %v528_v49 = vld [vmem:[#allocation9 + $0x170] sm:$0xff]  ;;  %v1292_v52 = vpack.c.bf16 %v495_v43, %v494_v42 }
 0x148   :  { %v1649_v57 = vadd.f32 %v1066_v48, %v907_v55  ;;  %v908_v58 = vpop.f32.mrb[4].mxu0  ;;  %v517_v48 = vld [vmem:[#allocation9 + $0x118] sm:$0xff]  ;;  %v503_v55 = vld [vmem:[#allocation9 + $0xa8] sm:$0xff] }
 0x149   :  { %v909_v59 = vpop.f32.mrb[5].mxu0  ;;  %v1302_v50 = vpack.c.bf16 %v517_v48, %v516_v47  ;;  %1273 = vmatpush3.bf16.msra.mxu1 %v1272_v53  ;;  %v512_v47 = vld [vmem:[#allocation9 + $0xf0] sm:$0xff]  ;;  %v513_v48 = vld [vmem:[#allocation9 + $0xf8] sm:$0xff] }
 0x14a   :  { %v910_v60 = vadd.f32 %v909_v59, %v908_v58  ;;  %v328_v61 = vmul.f32 %v1649_v57, %v1649_v57  ;;  %v317_v2 = vadd.f32 %v1649_v57, %v1647_v51  ;;  %v518_v58 = vld [vmem:[#allocation9 + $0x120] sm:$0xff]  ;;  %v519_v59 = vld [vmem:[#allocation9 + $0x128] sm:$0xff]  ;;  %v1294_v53 = vpack.c.bf16 %v513_v48, %v512_v47 }
 0x14c   :  { %v1653_v62 = vadd.f32 %v910_v60, %v306_v56  ;;  %v911_v63 = vpop.f32.mrb[6].mxu0  ;;  %v331_v6 = vadd.f32 %v328_v61, %v327_v1  ;;  %v486_v60 = vld [vmem:[#allocation9 + $0x20] sm:$0xff]  ;;  %v1306_v61 = vpack.c.bf16 %v519_v59, %v518_v58  ;;  %v504_v1 = vld [vmem:[#allocation9 + $0xb0] sm:$0xff] }
 0x14d   :  { %v912_v0 = vpop.f32.mrb[7].mxu0 }
 0x14e   :  { %v329_v3 = vmul.f32 %v1653_v62, %v1653_v62  ;;  %v913_v4 = vadd.f32 %v912_v0, %v911_v63  ;;  %v318_v5 = vadd.f32 %v317_v2, %v1653_v62  ;;  %v487_v63 = vld [vmem:[#allocation9 + $0x28] sm:$0xff]  ;;  %v505_v2 = vld [vmem:[#allocation9 + $0xb8] sm:$0xff] }
 0x14f   :  { %v1276_v0 = vpack.c.bf16 %v487_v63, %v486_v60 }
 0x150   :  { %v1662_v7 = vadd.f32 %v1069_v54, %v913_v4  ;;  %v332_v8 = vadd.f32 %v331_v6, %v329_v3  ;;  %v502_v54 = vld [vmem:[#allocation9 + $0xa0] sm:$0xff]  ;;  %v1278_v3 = vpack.c.bf16 %v505_v2, %v504_v1  ;;  %v520_v4 = vld [vmem:[#allocation9 + $0x130] sm:$0xff] }
 0x151   :  { %v1274_v56 = vpack.c.bf16 %v503_v55, %v502_v54  ;;  %v488_v6 = vld [vmem:[#allocation9 + $0x30] sm:$0xff] }
 0x152   :  { %v319_v9 = vadd.f32 %v318_v5, %v1662_v7  ;;  %v330_v10 = vmul.f32 %v1662_v7, %v1662_v7  ;;  %v521_v5 = vld [vmem:[#allocation9 + $0x138] sm:$0xff]  ;;  %v496_v55 = vld [vmem:[#allocation9 + $0x70] sm:$0xff] }
 0x153   :  { %1275 = vmatprep.subr.bf16.mxu1 %v1274_v56  ;;  %v497_v56 = vld [vmem:[#allocation9 + $0x78] sm:$0xff] }
 0x154   :  { %v320_v11 = vrot.slane %v319_v9, 4  ;;  %v333_v12 = vadd.f32 %v332_v8, %v330_v10  ;;  %1277 = vmatpush3.bf16.msra.mxu1 %v1276_v0  ;;  %v1310_v8 = vpack.c.bf16 %v521_v5, %v520_v4  ;;  %v1296_v58 = vpack.c.bf16 %v497_v56, %v496_v55  ;;  %v315_v5 = vld [vmem:[%s1724_s2] sm:$0x1] }
 0x155   :  { %1279 = vmatprep.subr.bf16.mxu1 %v1278_v3  ;;  %v439_v3 = vlaneseq }
 0x156   :  { %v321_v13 = vadd.f32 %v320_v11, %v319_v9  ;;  %v334_v14 = vrot.slane %v333_v12, 4  ;;  %v489_v9 = vld [vmem:[#allocation9 + $0x38] sm:$0xff]  ;;  %v506_v11 = vld [vmem:[#allocation9 + $0xc0] sm:$0xff] }
 0x157   :  { %v1280_v10 = vpack.c.bf16 %v489_v9, %v488_v6  ;;  %v440_v4 = vshrl.u32 %v439_v3, 7 }
 0x158   :  { %v322_v15 = vrot.slane %v321_v13, 2  ;;  %v335_v16 = vadd.f32 %v334_v14, %v333_v12  ;;  %v507_v12 = vld [vmem:[#allocation9 + $0xc8] sm:$0xff]  ;;  %v522_v14 = vld [vmem:[#allocation9 + $0x140] sm:$0xff] }
 0x159   :  { %1281 = vmatpush3.bf16.msra.mxu1 %v1280_v10  ;;  %v1671_v6 = vsub.s32 0, %v440_v4  ;;  %v316_v10 = vld [vmem:[%s1725_s3] sm:$0x1] }
 0x15a   :  { %v323_v17 = vadd.f32 %v322_v15, %v321_v13  ;;  %v336_v18 = vrot.slane %v335_v16, 2  ;;  %v1282_v13 = vpack.c.bf16 %v507_v12, %v506_v11  ;;  %v523_v15 = vld [vmem:[#allocation9 + $0x148] sm:$0xff] }
 0x15c   :  { %v324_v19 = vrot.slane %v323_v17, 1  ;;  %v337_v20 = vadd.f32 %v336_v18, %v335_v16  ;;  %v490_v16 = vld [vmem:[#allocation9 + $0x40] sm:$0xff]  ;;  %v491_v18 = vld [vmem:[#allocation9 + $0x48] sm:$0xff]  ;;  %1283 = vmatprep.subr.bf16.mxu1 %v1282_v13 }
 0x15e   :  { %v325_v21 = vadd.f32 %v324_v19, %v323_v17  ;;  %v338_v24 = vrot.slane %v337_v20, 1  ;;  %v1314_v17 = vpack.c.bf16 %v523_v15, %v522_v14  ;;  %v1284_v19 = vpack.c.bf16 %v491_v18, %v490_v16 }
 0x160   :  { %326 = vst [vmem:[#allocation3] sm:$0x1] %v325_v21  ;;  %v339_v25 = vadd.f32 %v338_v24, %v337_v20  ;;  %v508_v20 = vld [vmem:[#allocation9 + $0xd0] sm:$0xff]  ;;  %v509_v21 = vld [vmem:[#allocation9 + $0xd8] sm:$0xff]  ;;  %1285 = vmatpush3.bf16.msra.mxu1 %v1284_v19 }
 0x161   :  { %v524_v24 = vld [vmem:[#allocation9 + $0x150] sm:$0xff] }
 0x162   :  { %340 = vst [vmem:[#allocation3 + $0x1] sm:$0x1] %v339_v25  ;;  %v1286_v25 = vpack.c.bf16 %v509_v21, %v508_v20 }
 0x164   :  { %1287 = vmatprep.subr.bf16.mxu1 %v1286_v25 }
 0x165   :  { %1289 = vmatpush3.bf16.msra.mxu1 %v1288_v33 }
 0x166   :  { %1291 = vmatprep.subr.bf16.mxu1 %v1290_v39 }
 0x169   :  { %v341_v27 = vld [vmem:[#allocation3] sm:$0x3]  ;;  %1293 = vmatpush3.bf16.msra.mxu1 %v1292_v52 }
 0x16a   :  { %1103 = vmatmul.mubr.f32.vlgmr.msra.gmra.mrb[8].mxu0 %v341_v27  ;;  %v525_v27 = vld [vmem:[#allocation9 + $0x158] sm:$0xff]  ;;  %1295 = vmatprep.subr.bf16.mxu1 %v1294_v53 }
 0x16b   :  { %1301 = vmatpush3.bf16.msra.mxu0 %v1298_v37  ;;  %v1318_v31 = vpack.c.bf16 %v525_v27, %v524_v24  ;;  %v526_v37 = vld [vmem:[#allocation9 + $0x160] sm:$0xff] }
 0x16c   :  { %1303 = vmatprep.subr.bf16.mxu0 %v1302_v50  ;;  %v1322_v46 = vpack.c.bf16 %v527_v40, %v526_v37 }
 0x16d   :  { %1297 = vmatpush3.bf16.msra.mxu1 %v1296_v58 }
 0x16e   :  { %1330 = vmatprep.subr.bf16.mxu1 %v1496_v23 }
 0x16f   :  { %1305 = vmatpush3.bf16.msra.mxu0 %v1302_v50  ;;  %v529_v50 = vld [vmem:[#allocation9 + $0x178] sm:$0xff] }
 0x170   :  { %1307 = vmatprep.subr.bf16.mxu0 %v1306_v61  ;;  %v1326_v54 = vpack.c.bf16 %v529_v50, %v528_v49 }
 0x173   :  { %1309 = vmatpush3.bf16.msra.mxu0 %v1306_v61 }
 0x174   :  { %1311 = vmatprep.subr.bf16.mxu0 %v1310_v8 }
 0x177   :  { %1313 = vmatpush3.bf16.msra.mxu0 %v1310_v8 }
 0x178   :  { %1315 = vmatprep.subr.bf16.mxu0 %v1314_v17 }
 0x17b   :  { %1317 = vmatpush3.bf16.msra.mxu0 %v1314_v17 }
 0x17c   :  { %1319 = vmatprep.subr.bf16.mxu0 %v1318_v31 }
 0x17f   :  { %1321 = vmatpush3.bf16.msra.mxu0 %v1318_v31 }
 0x180   :  { %1323 = vmatprep.subr.bf16.mxu0 %v1322_v46 }
 0x183   :  { %1325 = vmatpush3.bf16.msra.mxu0 %v1322_v46 }
 0x184   :  { %1327 = vmatprep.subr.bf16.mxu0 %v1326_v54 }
 0x187   :  { %1329 = vmatpush3.bf16.msra.mxu0 %v1326_v54 }
 0x23d   :  { %v424_v59 = vpop.f32.mrb[8].mxu0 }
 0x23e   :  { %428 = vst [vmem:[#allocation3] sm:$0x3] %v424_v59  ;;  %v1104_v60 = vpop.f32.mrb[9].mxu0 }
 0x245   :  { %v429_v61 = vld [vmem:[#allocation3] sm:$0x1]  ;;  %v430_v0 = vld [vmem:[#allocation3 + $0x1] sm:$0x1] }
 0x246   :  { %v431_v63 = vmul.f32 %v429_v61, %v429_v61 }
 0x248   :  { %v432_v1 = vsub.f32 %v430_v0, %v431_v63 }
 0x24a   :  { %v433_v2 = vadd.f32 1e-05, %v432_v1 }
 0x24c   :  { %1366 = vrsqrt.f32 %v433_v2 }
 0x256   :  { %v1367_v8 = vpop.eup %1366 }
 0x257   :  { %v435_v9 = vmul.f32 %v1367_v8, %v315_v5 }
 0x259   :  { %v436_v11 = vmul.f32 %v435_v9, %v429_v61  ;;  %v442_v12 = vrot.slane %v435_v9, %v1671_v6 }
 0x25b   :  { %v437_v13 = vsub.f32 %v316_v10, %v436_v11  ;;  %v444_v14 = vmul.f32 %v442_v12, %v1647_v51  ;;  %v445_v16 = vmul.f32 %v442_v12, %v1649_v57  ;;  %v446_v17 = vmul.f32 %v442_v12, %v1653_v62 }
 0x25c   :  { %v447_v18 = vmul.f32 %v442_v12, %v1662_v7 }
 0x25d   :  { %v452_v15 = vrot.slane %v437_v13, %v1671_v6 }
 0x25f   :  { %v454_v19 = vadd.f32 %v452_v15, %v444_v14  ;;  %v455_v20 = vadd.f32 %v452_v15, %v445_v16  ;;  %v456_v21 = vadd.f32 %v452_v15, %v446_v17  ;;  %v457_v24 = vadd.f32 %v452_v15, %v447_v18 }
 0x261   :  { %v458_v25 = vmax.f32 %v454_v19, 0.0  ;;  %v459_v27 = vmax.f32 %v455_v20, 0.0  ;;  %v460_v28 = vmax.f32 %v456_v21, 0.0  ;;  %v461_v30 = vmax.f32 %v457_v24, 0.0  ;;  %v700_v24 = vld [vmem:[%s1727_s5] sm:$0x1] }
 0x262   :  { %s1458_s5 = scalar_lea.vmem %s857_s19, 512 }
 0x263   :  { %466 = vst [vmem:[#allocation2 + $0x1] sm:$0xff] %v458_v25  ;;  %594 = vmatprep.mubr.f32.mxu1 %v458_v25  ;;  %467 = vst [vmem:[#allocation2 + $0x9] sm:$0xff] %v459_v27  ;;  %p1459_p4 = scmp.ne.s32.totalorder %s857_s19, %s1458_s5  ;;  %p1464_p6 = scmp.lt.s32.totalorder %s1458_s5, %s1458_s5 }
 0x264   :  { %468 = vst [vmem:[#allocation2 + $0x19] sm:$0xff] %v460_v28  ;;  %469 = vst [vmem:[#allocation2 + $0x21] sm:$0xff] %v461_v30 }
 0x265   :  { %p1465_p7 = por %p1464_p6, %p1463_p5 }
 0x267   :  { %p1466_p8 = pnand %p1465_p7, %p1459_p4 }
 0x26a   :  { %v478_v51 = vld [vmem:[#allocation2 + $0x2] sm:$0xff]  ;;  %v479_v57 = vld [vmem:[#allocation2 + $0xa] sm:$0xff] }
 0x26b   :  { %v470_v31 = vld [vmem:[#allocation2] sm:$0xff]  ;;  %1137 = vmatprep.mubr.f32.mxu0 %v478_v51  ;;  %v471_v7 = vld [vmem:[#allocation2 + $0x8] sm:$0xff]  ;;  %v472_v34 = vld [vmem:[#allocation2 + $0x18] sm:$0xff] }
 0x26c   :  { %595 = vmatmul.mubr.f32.vlgmr.msra.gmra.mrb[4].mxu1 %v470_v31  ;;  %1138 = vmatmul.mubr.f32.vlgmr.msra.gmra.mrb[10].mxu0 %v479_v57  ;;  %v480_v62 = vld [vmem:[#allocation2 + $0x1a] sm:$0xff]  ;;  %v481_v33 = vld [vmem:[#allocation2 + $0x22] sm:$0xff] }
 0x26d   :  { %599 = vmatprep.mubr.f32.mxu1 %v459_v27  ;;  %1140 = vmatprep.mubr.f32.mxu0 %v480_v62  ;;  %v473_v36 = vld [vmem:[#allocation2 + $0x20] sm:$0xff] }
 0x26e   :  { %1332 = vmatpush3.bf16.msra.mxu1 %v1609_v22 }
 0x26f   :  { %1333 = vmatprep.subr.bf16.mxu1 %v1496_v23 }
 0x270   :  { %600 = vmatmul.mubr.f32.gmra.mrb[6].mxu1 %v471_v7  ;;  %1141 = vmatmul.mubr.f32.gmra.mrb[12].mxu0 %v481_v33 }
 0x271   :  { %604 = vmatprep.mubr.f32.mxu1 %v460_v28  ;;  %v701_v28 = vld [vmem:[%s1728_s6] sm:$0x1] }
 0x272   :  { %1335 = vmatpush3.bf16.msra.mxu1 %v1614_v26 }
 0x273   :  { %1336 = vmatprep.subr.bf16.mxu1 %v1496_v23 }
 0x274   :  { %605 = vmatmul.mubr.f32.gmra.mrb[8].mxu1 %v472_v34 }
 0x275   :  { %609 = vmatprep.mubr.f32.mxu1 %v461_v30 }
 0x276   :  { %1338 = vmatpush3.bf16.msra.mxu1 %v1618_v29 }
 0x277   :  { %1339 = vmatprep.subr.bf16.mxu1 %v1496_v23 }
 0x278   :  { %610 = vmatmul.mubr.f32.gmra.mrb[10].mxu1 %v473_v36 }
 0x279   :  { %1175 = vmatprep.mubr.msk.f32.mxu1 %vm1497_vm0, %v1498_v45 }
 0x27a   :  { %1341 = vmatpush3.bf16.msra.mxu1 %v1622_v32 }
 0x27b   :  { %1342 = vmatprep.subr.bf16.mxu1 %v1496_v23 }
 0x27e   :  { %1344 = vmatpush3.bf16.msra.mxu1 %v1626_v35 }
 0x27f   :  { %1345 = vmatprep.subr.bf16.mxu1 %v1496_v23 }
 0x282   :  { %1347 = vmatpush3.bf16.msra.mxu1 %v1630_v38 }
 0x283   :  { %1348 = vmatprep.subr.bf16.mxu1 %v1496_v23 }
 0x286   :  { %1350 = vmatpush3.bf16.msra.mxu1 %v1634_v41 }
 0x287   :  { %1351 = vmatprep.subr.bf16.mxu1 %v1496_v23 }
 0x28a   :  { %1353 = vmatpush3.bf16.msra.mxu1 %v1637_v44 }
 0x33f   :  { %v983_v22 = vpop.f32.mrb[4].mxu1  ;;  %v1139_v26 = vpop.f32.mrb[10].mxu0 }
 0x340   :  { %v984_v29 = vpop.f32.mrb[5].mxu1  ;;  %v681_v45 = vpop.f32.mrb[11].mxu0 }
 0x341   :  { %v985_v32 = vadd.f32 %v984_v29, %v983_v22 }
 0x343   :  { %v682_v37 = vadd.f32 %v985_v32, %v681_v45  ;;  %v986_v39 = vpop.f32.mrb[6].mxu1  ;;  %v1142_v35 = vpop.f32.mrb[12].mxu0 }
 0x344   :  { %v987_v40 = vpop.f32.mrb[7].mxu1  ;;  %v691_v43 = vpop.f32.mrb[13].mxu0 }
 0x345   :  { %v988_v42 = vadd.f32 %v987_v40, %v986_v39  ;;  %v712_v44 = vmul.f32 %v682_v37, %v682_v37 }
 0x347   :  { %v687_v38 = vadd.f32 %v1139_v26, %v988_v42  ;;  %v989_v46 = vpop.f32.mrb[8].mxu1 }
 0x348   :  { %v990_v47 = vpop.f32.mrb[9].mxu1 }
 0x349   :  { %v991_v48 = vadd.f32 %v990_v47, %v989_v46  ;;  %v713_v41 = vmul.f32 %v687_v38, %v687_v38  ;;  %v702_v52 = vadd.f32 %v687_v38, %v682_v37 }
 0x34b   :  { %v692_v49 = vadd.f32 %v991_v48, %v691_v43  ;;  %v992_v23 = vpop.f32.mrb[10].mxu1  ;;  %v716_v55 = vadd.f32 %v713_v41, %v712_v44 }
 0x34c   :  { %v993_v50 = vpop.f32.mrb[11].mxu1 }
 0x34d   :  { %v714_v53 = vmul.f32 %v692_v49, %v692_v49  ;;  %v994_v54 = vadd.f32 %v993_v50, %v992_v23  ;;  %v703_v56 = vadd.f32 %v702_v52, %v692_v49 }
 0x34f   :  { %v697_v58 = vadd.f32 %v1142_v35, %v994_v54  ;;  %v717_v59 = vadd.f32 %v716_v55, %v714_v53 }
 0x351   :  { %v704_v60 = vadd.f32 %v703_v56, %v697_v58  ;;  %v715_v61 = vmul.f32 %v697_v58, %v697_v58 }
 0x353   :  { %v705_v63 = vrot.slane %v704_v60, 4  ;;  %v718_v0 = vadd.f32 %v717_v59, %v715_v61 }
 0x355   :  { %v706_v1 = vadd.f32 %v705_v63, %v704_v60  ;;  %v719_v2 = vrot.slane %v718_v0, 4 }
 0x357   :  { %v707_v3 = vrot.slane %v706_v1, 2  ;;  %v720_v4 = vadd.f32 %v719_v2, %v718_v0 }
 0x359   :  { %v708_v5 = vadd.f32 %v707_v3, %v706_v1  ;;  %v721_v8 = vrot.slane %v720_v4, 2 }
 0x35b   :  { %v709_v9 = vrot.slane %v708_v5, 1  ;;  %v722_v10 = vadd.f32 %v721_v8, %v720_v4 }
 0x35d   :  { %v710_v11 = vadd.f32 %v709_v9, %v708_v5  ;;  %v723_v12 = vrot.slane %v722_v10, 1 }
 0x35f   :  { %711 = vst [vmem:[#allocation3] sm:$0x1] %v710_v11  ;;  %v724_v13 = vadd.f32 %v723_v12, %v722_v10 }
 0x361   :  { %725 = vst [vmem:[#allocation3 + $0x1] sm:$0x1] %v724_v13 }
 0x368   :  { %v726_v14 = vld [vmem:[#allocation3] sm:$0x3] }
 0x369   :  { %1176 = vmatmul.mubr.f32.vlgmr.msra.gmra.mrb[12].mxu1 %v726_v14 }
 0x43c   :  { %v809_v15 = vpop.f32.mrb[12].mxu1 }
 0x43d   :  { %813 = vst [vmem:[#allocation3] sm:$0x3] %v809_v15  ;;  %v1177_v16 = vpop.f32.mrb[13].mxu1 }
 0x444   :  { %v814_v17 = vld [vmem:[#allocation3] sm:$0x1]  ;;  %v815_v19 = vld [vmem:[#allocation3 + $0x1] sm:$0x1] }
 0x445   :  { %v816_v18 = vmul.f32 %v814_v17, %v814_v17 }
 0x447   :  { %v817_v20 = vsub.f32 %v815_v19, %v816_v18 }
 0x449   :  { %v818_v21 = vadd.f32 1e-05, %v817_v20 }
 0x44b   :  { %1368 = vrsqrt.f32 %v818_v21 }
 0x455   :  { %v1369_v25 = vpop.eup %1368 }
 0x456   :  { %v820_v27 = vmul.f32 %v1369_v25, %v700_v24 }
 0x458   :  { %v821_v30 = vmul.f32 %v820_v27, %v814_v17  ;;  %v827_v51 = vrot.slane %v820_v27, %v1671_v6 }
 0x45a   :  { %v822_v31 = vsub.f32 %v701_v28, %v821_v30  ;;  %v829_v57 = vmul.f32 %v827_v51, %v682_v37  ;;  %v830_v62 = vmul.f32 %v827_v51, %v687_v38  ;;  %v831_v7 = vmul.f32 %v827_v51, %v692_v49 }
 0x45b   :  { %v832_v33 = vmul.f32 %v827_v51, %v697_v58 }
 0x45c   :  { %v837_v34 = vrot.slane %v822_v31, %v1671_v6 }
 0x45e   :  { %v839_v36 = vadd.f32 %v837_v34, %v829_v57  ;;  %v840_v22 = vadd.f32 %v837_v34, %v830_v62  ;;  %v841_v26 = vadd.f32 %v837_v34, %v831_v7  ;;  %v842_v29 = vadd.f32 %v837_v34, %v832_v33 }
 0x460   :  { %v843_v32 = vmax.f32 %v839_v36, 0.0  ;;  %v844_v45 = vmax.f32 %v840_v22, 0.0  ;;  %v845_v39 = vmax.f32 %v841_v26, 0.0  ;;  %v846_v35 = vmax.f32 %v842_v29, 0.0 }
 0x462   :  { %847 = vst [vmem:[#allocation12] sm:$0xff] %v843_v32  ;;  %848 = vst [vmem:[#allocation12 + $0x8] sm:$0xff] %v844_v45 }
 0x463   :  { %849 = vst [vmem:[#allocation12 + $0x10] sm:$0xff] %v845_v39  ;;  %850 = vst [vmem:[#allocation12 + $0x18] sm:$0xff] %v846_v35 }
 0x464   :  { %1469 = shalt.err (!%p1466_p8)
}
 0x465   :  { %s1470_s22 = scalar_lea.hbm %s1730_s8, 512 }
 0x466   :  { %p1471_p9 = scmp.ne.s32.totalorder %s1730_s8, %s1470_s22  ;;  %p1474_p10 = scmp.lt.u32.totalorder %s1470_s22, %s1730_s8 }
 0x468   :  { %p1476_p11 = pnand %p1474_p10, %p1471_p9 }
 0x46a   :  { %1479 = shalt.err (!%p1476_p11)
}
 0x46b   :  { %862 = dma.vmem_to_hbm [thread:$0]  %s857_s19, 512, %s1730_s8, [#allocation6], %s1489_s15, %s1489_s15, %s1490_s16  }
 0x46c   :  { %1486 = dma.done.wait [#allocation6], 512  }
 0x46d   :  { %1487 = vsyncadd [#allocation6], 4294966784 }
 0x46e   :  { %866 = vsyncpa [#allocation5], 1 }
 0x46f   :  { %867 = vsyncpa [#allocation8], 1 }
 0x470   :  { %868 = vsyncpa [#allocation11], 1 }
 0x471   :  { %869 = vsyncpa [#allocation6], 1 }

</bundles_post_ra>
